<compile_context>
chip_gen: v7x
topology: tpu7x:2x2x1
jax: 0.10.0
libtpu: 0.0.40
codegen_flags: <defaults>
</compile_context>

<pallas_src>
import functools

import jax
import jax.numpy as jnp
from jax.experimental import pallas as pl
from jax.experimental.pallas import tpu as pltpu


def _round_up(x: int, m: int) -> int:
    return ((x + m - 1) // m) * m


# ---------------------------------------------------------------------------
# Kernel
# ---------------------------------------------------------------------------
def swiglu_kernel(x_ref, wgu_ref, wd_ref, o_ref, acc_ref, *, th):
    # x_ref:   (TM, D)      token tile, resident across the H axis
    # wgu_ref: (D, 2*TH)    fused [gate_k | up_k] weight chunk (streams along H)
    # wd_ref:  (TH, D)      down-projection chunk (streams along H)
    # o_ref:   (TM, D)      output tile (written once, on the last H step)
    # acc_ref: (TM, D)      f32 accumulator scratch
    k = pl.program_id(1)

    @pl.when(k == 0)
    def _():
        acc_ref[...] = jnp.zeros_like(acc_ref)

    x = x_ref[...]
    # Single fused MXU matmul for gate|up: halves weight DMAs and MXU pushes/pops.
    gu = jnp.dot(x, wgu_ref[...], preferred_element_type=jnp.float32)
    gate = gu[:, :th]          # static, 128-aligned slices
    up = gu[:, th:]
    # SiLU gating in f32: sigmoid on the EUP, multiplies on the VPU, both hidden
    # under the two MXU matmuls at realistic D/H.
    h = (gate * jax.nn.sigmoid(gate)) * up

    acc_ref[...] += jnp.dot(h.astype(wd_ref.dtype), wd_ref[...],
                            preferred_element_type=jnp.float32)

    @pl.when(k == pl.num_programs(1) - 1)
    def _():
        o_ref[...] = acc_ref[...].astype(o_ref.dtype)


# ---------------------------------------------------------------------------
# Tile selection (per TPU generation)
# ---------------------------------------------------------------------------
def _tpu_generation_and_vmem():
    kind = ""
    try:
        kind = jax.devices()[0].device_kind.lower()
    except Exception:
        pass
    if "v5" in kind:
        gen, cap = "v5", 128 * 1024 * 1024
    elif "v6" in kind:
        gen, cap = "v6", 128 * 1024 * 1024
    elif "v7" in kind or "7x" in kind:
        gen, cap = "v7", 64 * 1024 * 1024
    else:
        gen, cap = "unknown", 64 * 1024 * 1024      # conservative fallback
    try:
        cap = int(pltpu.get_tpu_info().vmem_capacity_bytes)
    except Exception:
        pass
    return gen, cap


def _pick_th(H: int, th_target: int) -> int:
    """Pick a hidden-dim tile: a 128-multiple divisor of H when possible."""
    th_target = max(128, (th_target // 128) * 128)
    if th_target >= H:
        return H
    for cand in range(th_target, max(th_target // 2, 128) - 1, -128):
        if H % cand == 0:
            return cand                     # divides H -> no weight padding needed
    return th_target                        # fall back to one-time zero padding of H


def _pick_tiles(M, D, H, x_dtype, w_dtype, tm_user=None, th_user=None):
    gen, vmem_cap = _tpu_generation_and_vmem()
    xb = jnp.dtype(x_dtype).itemsize
    wb = jnp.dtype(w_dtype).itemsize
    sub = {1: 32, 2: 16}.get(xb, 8)         # sublane packing of the x dtype

    if tm_user is None:
        tm = {"v5": 256, "v6": 1024, "v7": 512}.get(gen, 256)
    else:
        tm = max(sub, _round_up(int(tm_user), sub))
    th_target = int(th_user) if th_user is not None else \
        {"v5": 2048, "v6": 1024, "v7": 512}.get(gen, 512)
    th = _pick_th(H, th_target)

    # Fit the tile footprint into a per-generation VMEM budget (not a blanket 64 MiB).
    budget = int(vmem_cap * 0.75)

    def need(tm_, th_):
        return (2 * (3 * D * th_ * wb)      # fused (D,2*th) + down (th,D), double-buffered
                + 2 * (2 * tm_ * D * xb)    # x + out tiles, double-buffered
                + tm_ * D * 4               # f32 accumulator scratch
                + 3 * tm_ * th_ * 4)        # f32 intermediates (gu, h)

    while need(tm, th) > budget:
        if th >= 256 and (th // 2) % 128 == 0:
            th //= 2
        elif tm > 256:
            tm = max(256, tm // 2)
        else:
            break

    # Balance the token tile across ceil(M/tm) tiles (no nearly-empty padded
    # trailing tile); on v7x force >=2 M tiles so both TensorCores get work.
    n_m = max(1, -(-M // tm))
    if gen == "v7" and n_m == 1 and M >= 2 * 128 and tm_user is None:
        n_m = 2
    align = 256 if (M >= 256 and tm_user is None) else sub
    tm_eff = max(sub, _round_up(-(-M // n_m), align))
    M_pad = _round_up(M, tm_eff)

    vmem_limit = int(min(max(need(tm_eff, th) * 5 // 4, 32 * 1024 * 1024),
                         int(vmem_cap * 0.9)))
    return tm_eff, th, M_pad, vmem_limit


# ---------------------------------------------------------------------------
# Weight preparation (run ONCE at parameter-load time in production)
# ---------------------------------------------------------------------------
def prepare_swiglu_weights(wg, wu, wd, *, th):
    """Fuse gate|up per H tile into one (D, 2*H_pad) operand and zero-pad H.

    Zero-padded hidden units contribute exactly zero: silu(0) * 0 = 0.
    """
    D, H = wg.shape
    H_pad = _round_up(H, th)
    if H_pad != H:
        wg = jnp.pad(wg, ((0, 0), (0, H_pad - H)))
        wu = jnp.pad(wu, ((0, 0), (0, H_pad - H)))
        wd = jnp.pad(wd, ((0, H_pad - H), (0, 0)))
    n_k = H_pad // th
    wgu = jnp.concatenate(
        [wg.reshape(D, n_k, th), wu.reshape(D, n_k, th)], axis=2
    ).reshape(D, 2 * H_pad)
    return wgu, wd


# ---------------------------------------------------------------------------
# Pallas call
# ---------------------------------------------------------------------------
@functools.partial(jax.jit, static_argnames=("tm", "th", "vmem_limit"))
def _swiglu_call(x2d, wgu, wd, *, tm, th, vmem_limit):
    M_pad, D = x2d.shape
    H_pad = wgu.shape[1] // 2
    grid = (M_pad // tm, H_pad // th)

    xb = jnp.dtype(x2d.dtype).itemsize
    wb = jnp.dtype(wgu.dtype).itemsize
    cost = pl.CostEstimate(
        flops=6 * M_pad * D * H_pad,
        transcendentals=M_pad * H_pad,
        bytes_accessed=(M_pad * D * xb                       # x reads
                        + M_pad * D * xb                     # out writes
                        + 3 * D * H_pad * wb * grid[0]),     # weights re-streamed per M tile
    )

    kernel = functools.partial(swiglu_kernel, th=th)
    return pl.pallas_call(
        kernel,
        out_shape=jax.ShapeDtypeStruct((M_pad, D), x2d.dtype),
        grid_spec=pltpu.PrefetchScalarGridSpec(
            num_scalar_prefetch=0,
            grid=grid,
            in_specs=[
                pl.BlockSpec((tm, D), lambda i, k: (i, 0)),        # x (resident over H)
                pl.BlockSpec((D, 2 * th), lambda i, k: (0, k)),    # fused [gate|up] chunk
                pl.BlockSpec((th, D), lambda i, k: (k, 0)),        # down-proj chunk
            ],
            out_specs=pl.BlockSpec((tm, D), lambda i, k: (i, 0)),
            scratch_shapes=[pltpu.VMEM((tm, D), jnp.float32)],
        ),
        compiler_params=pltpu.CompilerParams(
            dimension_semantics=("parallel", "arbitrary"),
            vmem_limit_bytes=vmem_limit,
        ),
        cost_estimate=cost,
    )(x2d, wgu, wd)


def swiglu_mlp(x, wg, wu, wd, *, tm=None, th=None):
    """x: (B, S, D); wg/wu: (D, H); wd: (H, D). Returns (B, S, D).

    tm/th default to per-generation values (v5e: 256/2048, v6e: 1024/1024,
    v7x: 512/512), clamped to the chip's VMEM budget.
    """
    B, S, D = x.shape
    H = wg.shape[1]
    M = B * S

    tm_eff, th_eff, M_pad, vmem_limit = _pick_tiles(
        M, D, H, x.dtype, wg.dtype, tm_user=tm, th_user=th)

    # One-time weight fusion / padding. In production hoist this out of the
    # per-call path and cache it alongside the parameters.
    wgu, wd_p = prepare_swiglu_weights(wg, wu, wd, th=th_eff)

    x2d = x.reshape(M, D)
    if M_pad != M:
        x2d = jnp.pad(x2d, ((0, M_pad - M), (0, 0)))

    out2d = _swiglu_call(x2d, wgu, wd_p, tm=tm_eff, th=th_eff,
                         vmem_limit=vmem_limit)
    if M_pad != M:
        out2d = out2d[:M]
    return out2d.reshape(B, S, D)


# ---------------------------------------------------------------------------
# Reference + tests
# ---------------------------------------------------------------------------
def reference_swiglu(x, wg, wu, wd):
    gate = jax.nn.silu(jnp.einsum("bsd,dh->bsh", x, wg))
    up = jnp.einsum("bsd,dh->bsh", x, wu)
    return jnp.einsum("bsh,hd->bsd", gate * up, wd)


if __name__ == "__main__":
    # Dropout(p=0.0) in the reference module is an identity in forward -> omitted.
    key = jax.random.PRNGKey(0)

    # --- Small shapes consistent with the module: dim=32, hidden_dim=dim*4=128.
    B, S, D = 2, 8, 32
    H = D * 4
    kx, kg, ku, kd = jax.random.split(key, 4)
    x = jax.random.normal(kx, (B, S, D), dtype=jnp.float32)
    s_in, s_hid = 1.0 / (D ** 0.5), 1.0 / (H ** 0.5)
    wg = jax.random.uniform(kg, (D, H), minval=-s_in, maxval=s_in, dtype=jnp.float32)
    wu = jax.random.uniform(ku, (D, H), minval=-s_in, maxval=s_in, dtype=jnp.float32)
    wd = jax.random.uniform(kd, (H, D), minval=-s_hid, maxval=s_hid, dtype=jnp.float32)

    out = jax.block_until_ready(swiglu_mlp(x, wg, wu, wd))
    ref = reference_swiglu(x, wg, wu, wd)
    assert out.shape == (B, S, D)
    assert jnp.allclose(out, ref, atol=1e-4, rtol=1e-4), "f32 mismatch vs reference"

    # --- Exercise the M-padding path (B*S not a multiple of the token tile).
    x_odd = x[:1, :5]
    out_odd = jax.block_until_ready(swiglu_mlp(x_odd, wg, wu, wd))
    ref_odd = reference_swiglu(x_odd, wg, wu, wd)
    assert out_odd.shape == (1, 5, D)
    assert jnp.allclose(out_odd, ref_odd, atol=1e-4, rtol=1e-4), "padded-M mismatch"

    # --- Exercise the H-tiled reduction path with the fused/interleaved weights
    #     (D=128, H=512, th=128 -> 4 H steps through the f32 accumulator).
    D2, H2 = 128, 512
    k2 = jax.random.split(key, 5)
    x2 = jax.random.normal(k2[0], (B, S, D2), dtype=jnp.float32)
    s_in2, s_hid2 = 1.0 / (D2 ** 0.5), 1.0 / (H2 ** 0.5)
    wg2 = jax.random.uniform(k2[1], (D2, H2), minval=-s_in2, maxval=s_in2, dtype=jnp.float32)
    wu2 = jax.random.uniform(k2[2], (D2, H2), minval=-s_in2, maxval=s_in2, dtype=jnp.float32)
    wd2 = jax.random.uniform(k2[3], (H2, D2), minval=-s_hid2, maxval=s_hid2, dtype=jnp.float32)
    out2 = jax.block_until_ready(swiglu_mlp(x2, wg2, wu2, wd2, tm=256, th=128))
    ref2 = reference_swiglu(x2, wg2, wu2, wd2)
    assert out2.shape == (B, S, D2)
    assert jnp.allclose(out2, ref2, atol=1e-4, rtol=1e-4), "H-tiled mismatch"

    # --- bf16 path (performance-relevant dtype); accumulation stays f32.
    xb, wgb, wub, wdb = (a.astype(jnp.bfloat16) for a in (x, wg, wu, wd))
    out_bf16 = jax.block_until_ready(swiglu_mlp(xb, wgb, wub, wdb))
    ref_bf16 = reference_swiglu(xb.astype(jnp.float32), wgb.astype(jnp.float32),
                                wub.astype(jnp.float32), wdb.astype(jnp.float32))
    assert out_bf16.shape == (B, S, D)
    assert jnp.allclose(out_bf16.astype(jnp.float32), ref_bf16,
                        atol=5e-2, rtol=5e-2), "bf16 mismatch vs reference"

    print("KERNEL_OK")
</pallas_src>

<mosaic_0001>
module attributes {stable_mosaic.version = 11 : i64} {
  func.func @swiglu_kernel(%arg0: i32, %arg1: i32, %arg2: memref<16x32xf32, #tpu.memory_space<vmem>>, %arg3: memref<32x256xf32, #tpu.memory_space<vmem>>, %arg4: memref<128x32xf32, #tpu.memory_space<vmem>>, %arg5: memref<16x32xf32, #tpu.memory_space<vmem>>, %arg6: memref<16x32xf32, #tpu.memory_space<vmem>>) attributes {dimension_semantics = [#tpu.dimension_semantics<parallel>, #tpu.dimension_semantics<arbitrary>], iteration_bounds = array<i64: 1, 1>, scalar_prefetch = 0 : i64, scratch_operands = 1 : i64, tpu.core_type = #tpu.core_type<tc>, window_params = [{transform_indices = @transform_0, window_bounds = array<i64: 16, 32>}, {transform_indices = @transform_1, window_bounds = array<i64: 32, 256>}, {transform_indices = @transform_2, window_bounds = array<i64: 128, 32>}, {transform_indices = @transform_3, window_bounds = array<i64: 16, 32>}]} {
    %c0_i32 = arith.constant 0 : i32
    %0 = arith.cmpi eq, %arg1, %c0_i32 : i32
    %1 = arith.extui %0 : i1 to i32
    %c0_i32_0 = arith.constant 0 : i32
    %2 = arith.cmpi ne, %1, %c0_i32_0 : i32
    scf.if %2 {
      %cst_14 = arith.constant 0.000000e+00 : f32
      %23 = vector.broadcast %cst_14 : f32 to vector<16x32xf32>
      %c0_15 = arith.constant 0 : index
      %c0_16 = arith.constant 0 : index
      %24 = vector.load %arg6[%c0_15, %c0_16] : memref<16x32xf32, #tpu.memory_space<vmem>>, vector<16x32xf32>
      tpu.vector_store %arg6[%c0_15, %c0_16], %23 {strides = array<i32>} : memref<16x32xf32, #tpu.memory_space<vmem>>, vector<16x32xf32>,
    } else {
    }
    %c0 = arith.constant 0 : index
    %c0_1 = arith.constant 0 : index
    %3 = vector.load %arg2[%c0, %c0_1] : memref<16x32xf32, #tpu.memory_space<vmem>>, vector<16x32xf32>
    %c0_2 = arith.constant 0 : index
    %c0_3 = arith.constant 0 : index
    %4 = vector.load %arg3[%c0_2, %c0_3] : memref<32x256xf32, #tpu.memory_space<vmem>>, vector<32x256xf32>
    %cst = arith.constant dense<0.000000e+00> : vector<16x256xf32>
    %5 = tpu.matmul %3, %4, %cst {dimension_numbers = #tpu.dot_dimension_numbers<[1], [0], [0], [1], [0, 0, 1, 1], [], []>} : vector<16x32xf32>, vector<32x256xf32>, vector<16x256xf32> -> vector<16x256xf32>
    %6 = vector.extract_strided_slice %5 {offsets = [0, 0], sizes = [16, 128], strides = [1, 1]} : vector<16x256xf32> to vector<16x128xf32>
    %7 = vector.extract_strided_slice %5 {offsets = [0, 128], sizes = [16, 128], strides = [1, 1]} : vector<16x256xf32> to vector<16x128xf32>
    %8 = arith.negf %6 : vector<16x128xf32>
    %9 = math.exp %8 : vector<16x128xf32>
    %cst_4 = arith.constant 1.000000e+00 : f32
    %10 = vector.broadcast %cst_4 : f32 to vector<16x128xf32>
    %11 = arith.addf %10, %9 : vector<16x128xf32>
    %12 = arith.divf %10, %11 : vector<16x128xf32>
    %13 = arith.mulf %6, %12 : vector<16x128xf32>
    %14 = arith.mulf %13, %7 : vector<16x128xf32>
    %c0_5 = arith.constant 0 : index
    %c0_6 = arith.constant 0 : index
    %15 = vector.load %arg6[%c0_5, %c0_6] : memref<16x32xf32, #tpu.memory_space<vmem>>, vector<16x32xf32>
    %c0_7 = arith.constant 0 : index
    %c0_8 = arith.constant 0 : index
    %16 = vector.load %arg4[%c0_7, %c0_8] : memref<128x32xf32, #tpu.memory_space<vmem>>, vector<128x32xf32>
    %cst_9 = arith.constant dense<0.000000e+00> : vector<16x32xf32>
    %17 = tpu.matmul %14, %16, %cst_9 {dimension_numbers = #tpu.dot_dimension_numbers<[1], [0], [0], [1], [0, 0, 1, 1], [], []>} : vector<16x128xf32>, vector<128x32xf32>, vector<16x32xf32> -> vector<16x32xf32>
    %18 = arith.addf %15, %17 : vector<16x32xf32>
    %c0_10 = arith.constant 0 : index
    %c0_11 = arith.constant 0 : index
    %19 = vector.load %arg6[%c0_10, %c0_11] : memref<16x32xf32, #tpu.memory_space<vmem>>, vector<16x32xf32>
    tpu.vector_store %arg6[%c0_10, %c0_11], %18 {strides = array<i32>} : memref<16x32xf32, #tpu.memory_space<vmem>>, vector<16x32xf32>,
    %c0_i32_12 = arith.constant 0 : i32
    %20 = arith.cmpi eq, %arg1, %c0_i32_12 : i32
    %21 = arith.extui %20 : i1 to i32
    %c0_i32_13 = arith.constant 0 : i32
    %22 = arith.cmpi ne, %21, %c0_i32_13 : i32
    scf.if %22 {
      %c0_14 = arith.constant 0 : index
      %c0_15 = arith.constant 0 : index
      %23 = vector.load %arg6[%c0_14, %c0_15] : memref<16x32xf32, #tpu.memory_space<vmem>>, vector<16x32xf32>
      %c0_16 = arith.constant 0 : index
      %c0_17 = arith.constant 0 : index
      %24 = vector.load %arg5[%c0_16, %c0_17] : memref<16x32xf32, #tpu.memory_space<vmem>>, vector<16x32xf32>
      tpu.vector_store %arg5[%c0_16, %c0_17], %23 {strides = array<i32>} : memref<16x32xf32, #tpu.memory_space<vmem>>, vector<16x32xf32>,
    } else {
    }
    return
  }
  func.func @transform_0(%arg0: i32, %arg1: i32) -> (i32, i32) {
    %c0_i32 = arith.constant 0 : i32
    %c0_i32_0 = arith.constant 0 : i32
    return %arg0, %c0_i32 : i32, i32
  }
  func.func @transform_1(%arg0: i32, %arg1: i32) -> (i32, i32) {
    %c0_i32 = arith.constant 0 : i32
    %c0_i32_0 = arith.constant 0 : i32
    return %c0_i32, %arg1 : i32, i32
  }
  func.func @transform_2(%arg0: i32, %arg1: i32) -> (i32, i32) {
    %c0_i32 = arith.constant 0 : i32
    %c0_i32_0 = arith.constant 0 : i32
    return %arg1, %c0_i32 : i32, i32
  }
  func.func @transform_3(%arg0: i32, %arg1: i32) -> (i32, i32) {
    %c0_i32 = arith.constant 0 : i32
    %c0_i32_0 = arith.constant 0 : i32
    return %arg0, %c0_i32 : i32, i32
  }
}

</mosaic_0001>

<bundles_post_ra>
// kernel: _swiglu_call.1
= control target key start
LH: loop header
LB: loop body
LE: loop exit
PB: predicated region body
PF: predicated region fallthrough
CT: control target
= control target key end

     0   :  { %vm19_vm0 = vcmask 261120   ;;  %v385_v7 = vmov 0.0   ;;  %s507_s0 = inlined_call_operand.vmem [shape: f32[16,32], index: 0, kind: input, shape index: {}]   ;;  %s508_s1 = inlined_call_operand.vmem [shape: f32[32,256], index: 1, kind: input, shape index: {}]   ;;  %s509_s2 = inlined_call_operand.vmem [shape: f32[128,32], index: 2, kind: input, shape index: {}]   ;;  %s510_s3 = inlined_call_operand.hbm [shape: f32[16,32], index: 3, kind: output, shape index: {}]  }
   0x1   :  { %v25_v0 = vld [vmem:[%s508_s1 + $0x8] sm:$0xff]  ;;  %v27_v1 = vld [vmem:[%s508_s1 + $0x18] sm:$0xff]  ;;  %v24_v2 = vld [vmem:[%s508_s1] sm:$0xff]  ;;  %20 = vst.msk [vmem:[#allocation2] sm:$0xff] %vm19_vm0, %v385_v7  ;;  %103 = vmatprep.mubr.f32.mxu0 %v385_v7 }
   0x2   :  { %v309_v3 = vpack.c.bf16 %v27_v1, %v25_v0  ;;  %v26_v4 = vld [vmem:[%s508_s1 + $0x10] sm:$0xff]  ;;  %v29_v5 = vld [vmem:[%s508_s1 + $0x28] sm:$0xff]  ;;  %v31_v6 = vld [vmem:[%s508_s1 + $0x38] sm:$0xff]  ;;  %21 = vst.msk [vmem:[#allocation2 + $0x8] sm:$0xff] %vm19_vm0, %v385_v7 }
   0x3   :  { %v311_v8 = vpack.c.bf16 %v26_v4, %v24_v2  ;;  %v313_v9 = vpack.c.bf16 %v31_v6, %v29_v5  ;;  %v28_v10 = vld [vmem:[%s508_s1 + $0x20] sm:$0xff]  ;;  %v30_v11 = vld [vmem:[%s508_s1 + $0x30] sm:$0xff] }
   0x4   :  { %310 = vmatprep.subr.bf16.mxu0 %v309_v3 }
   0x5   :  { %8 = vsyncpa [#allocation4], 0  ;;  %312 = vmatpush1.bf16.msra.mxu0 %v311_v8  ;;  %v315_v12 = vpack.c.bf16 %v30_v11, %v28_v10  ;;  %v22_v13 = vld [vmem:[%s507_s0] sm:$0xff]  ;;  %v23_v14 = vld [vmem:[%s507_s0 + $0x8] sm:$0xff] }
   0x6   :  { %314 = vmatprep.subr.bf16.mxu0 %v313_v9  ;;  %v134_v15 = vld [vmem:[%s509_s2] sm:$0xff]  ;;  %v135_v16 = vld [vmem:[%s509_s2 + $0x8] sm:$0xff]  ;;  %v136_v18 = vld [vmem:[%s509_s2 + $0x10] sm:$0xff] }
   0x7   :  { %v317_v17 = vpack.c.bf16 %v135_v16, %v134_v15  ;;  %v137_v19 = vld [vmem:[%s509_s2 + $0x18] sm:$0xff]  ;;  %v138_v21 = vld [vmem:[%s509_s2 + $0x20] sm:$0xff]  ;;  %v139_v22 = vld [vmem:[%s509_s2 + $0x28] sm:$0xff] }
   0x8   :  { %v321_v20 = vpack.c.bf16 %v137_v19, %v136_v18  ;;  %v325_v23 = vpack.c.bf16 %v139_v22, %v138_v21  ;;  %v140_v24 = vld [vmem:[%s509_s2 + $0x30] sm:$0xff]  ;;  %v141_v25 = vld [vmem:[%s509_s2 + $0x38] sm:$0xff]  ;;  %v142_v27 = vld [vmem:[%s509_s2 + $0x40] sm:$0xff] }
   0x9   :  { %316 = vmatpush1.bf16.msra.mxu0 %v315_v12  ;;  %318 = vmatprep.subr.bf16.mxu1 %v317_v17  ;;  %v329_v26 = vpack.c.bf16 %v141_v25, %v140_v24  ;;  %v143_v28 = vld [vmem:[%s509_s2 + $0x48] sm:$0xff]  ;;  %v144_v30 = vld [vmem:[%s509_s2 + $0x50] sm:$0xff]  ;;  %v145_v31 = vld [vmem:[%s509_s2 + $0x58] sm:$0xff] }
   0xa   :  { %320 = vmatpush3.bf16.msra.mxu1 %v317_v17  ;;  %v333_v29 = vpack.c.bf16 %v143_v28, %v142_v27  ;;  %v337_v32 = vpack.c.bf16 %v145_v31, %v144_v30  ;;  %v146_v33 = vld [vmem:[%s509_s2 + $0x60] sm:$0xff]  ;;  %v147_v34 = vld [vmem:[%s509_s2 + $0x68] sm:$0xff]  ;;  %v148_v36 = vld [vmem:[%s509_s2 + $0x70] sm:$0xff] }
   0xb   :  { %322 = vmatprep.subr.bf16.mxu1 %v321_v20  ;;  %v341_v35 = vpack.c.bf16 %v147_v34, %v146_v33  ;;  %v149_v37 = vld [vmem:[%s509_s2 + $0x78] sm:$0xff]  ;;  %v133_v55 = vld [vmem:[#allocation2 + $0x8] sm:$0xff]  ;;  %v132_v56 = vld [vmem:[#allocation2] sm:$0xff]  ;;  %s386_s2 = smov [#allocation3]  }
   0xc   :  { %252 = vmatmul.mubr.msk.f32.vlgmr.msra.gmra.mrb[0].mxu0 %vm19_vm0, %v22_v13  ;;  %v345_v38 = vpack.c.bf16 %v149_v37, %v148_v36  ;;  %s241_s7 = sshll.u32 %s386_s2, 4  ;;  %s242_s7 = int_to_ptr.vmem [resolvable:$true] %s241_s7 }
   0xd   :  { %109 = vmatprep.mubr.f32.mxu0 %v385_v7  ;;  %s361_s8 = scalar_lea.vmem %s242_s7, 256  ;;  %p366_p1 = scmp.lt.s32.totalorder %s242_s7, %s242_s7 }
   0xe   :  { %324 = vmatpush3.bf16.msra.mxu1 %v321_v20  ;;  %p362_p0 = scmp.ne.s32.totalorder %s242_s7, %s361_s8  ;;  %p367_p2 = scmp.lt.s32.totalorder %s361_s8, %s361_s8 }
   0xf   :  { %326 = vmatprep.subr.bf16.mxu1 %v325_v23 }
  0x10   :  { %253 = vmatmul.mubr.msk.f32.gmra.mrb[2].mxu0 %vm19_vm0, %v23_v14  ;;  %p368_p3 = por %p367_p2, %p366_p1 }
  0x12   :  { %328 = vmatpush3.bf16.msra.mxu1 %v325_v23  ;;  %p369_p4 = pnand %p368_p3, %p362_p0 }
  0x13   :  { %330 = vmatprep.subr.bf16.mxu1 %v329_v26 }
  0x16   :  { %332 = vmatpush3.bf16.msra.mxu1 %v329_v26 }
  0x17   :  { %334 = vmatprep.subr.bf16.mxu1 %v333_v29 }
  0x1a   :  { %336 = vmatpush3.bf16.msra.mxu1 %v333_v29 }
  0x1b   :  { %338 = vmatprep.subr.bf16.mxu1 %v337_v32 }
  0x1e   :  { %340 = vmatpush3.bf16.msra.mxu1 %v337_v32 }
  0x1f   :  { %342 = vmatprep.subr.bf16.mxu1 %v341_v35 }
  0x22   :  { %344 = vmatpush3.bf16.msra.mxu1 %v341_v35 }
  0x23   :  { %346 = vmatprep.subr.bf16.mxu1 %v345_v38 }
  0x26   :  { %348 = vmatpush3.bf16.msra.mxu1 %v345_v38 }
  0xdf   :  { %v105_v39 = vpop.f32.mrb[0].mxu0 }
  0xe0   :  { %v254_v40 = vmul.f32 -1.442695, %v105_v39  ;;  %v107_v41 = vpop.f32.mrb[1].mxu0 }
  0xe2   :  { %353 = vpow2.f32 %v254_v40 }
  0xe3   :  { %v111_v42 = vpop.f32.mrb[2].mxu0 }
  0xe4   :  { %v255_v43 = vmul.f32 -1.442695, %v111_v42  ;;  %v113_v44 = vpop.f32.mrb[3].mxu0 }
  0xe6   :  { %355 = vpow2.f32 %v255_v43 }
  0xec   :  { %v354_v45 = vpop.eup %353 }
  0xed   :  { %v122_v46 = vadd.f32 1.0, %v354_v45 }
  0xef   :  { %357 = vrcp.f32 %v122_v46 }
  0xf0   :  { %v356_v47 = vpop.eup %355 }
  0xf1   :  { %v123_v48 = vadd.f32 1.0, %v356_v47 }
  0xf3   :  { %359 = vrcp.f32 %v123_v48 }
  0xf9   :  { %v358_v49 = vpop.eup %357 }
  0xfa   :  { %v128_v50 = vmul.f32 %v358_v49, %v105_v39 }
  0xfc   :  { %v130_v51 = vmul.f32 %v128_v50, %v107_v41 }
  0xfd   :  { %v360_v52 = vpop.eup %359 }
  0xfe   :  { %v129_v53 = vmul.f32 %v360_v52, %v111_v42  ;;  %306 = vmatprep.mubr.f32.mxu1 %v130_v51 }
 0x100   :  { %v131_v54 = vmul.f32 %v129_v53, %v113_v44 }
 0x102   :  { %307 = vmatmul.mubr.f32.vlgmr.msra.gmra.mrb[0].mxu1 %v131_v54 }
 0x1d5   :  { %v308_v57 = vpop.f32.mrb[0].mxu1 }
 0x1d6   :  { %v226_v58 = vadd.f32 %v308_v57, %v133_v55  ;;  %v216_v59 = vpop.f32.mrb[1].mxu1 }
 0x1d7   :  { %v225_v60 = vadd.f32 %v216_v59, %v132_v56 }
 0x1d8   :  { %228 = vst.msk [vmem:[#allocation2 + $0x8] sm:$0xff] %vm19_vm0, %v226_v58 }
 0x1d9   :  { %227 = vst.msk [vmem:[#allocation2] sm:$0xff] %vm19_vm0, %v225_v60 }
 0x1df   :  { %v233_v61 = vld [vmem:[#allocation2 + $0x8] sm:$0xff] }
 0x1e0   :  { %v232_v62 = vld [vmem:[#allocation2] sm:$0xff]  ;;  %235 = vst.msk [vmem:[#allocation3 + $0x8] sm:$0xff] %vm19_vm0, %v233_v61 }
 0x1e1   :  { %234 = vst.msk [vmem:[#allocation3] sm:$0xff] %vm19_vm0, %v232_v62 }
 0x1e2   :  { %372 = shalt.err (!%p369_p4)
}
 0x1e3   :  { %s373_s11 = scalar_lea.hbm %s510_s3, 256 }
 0x1e4   :  { %p374_p5 = scmp.ne.s32.totalorder %s510_s3, %s373_s11  ;;  %p377_p6 = scmp.lt.u32.totalorder %s373_s11, %s510_s3 }
 0x1e6   :  { %p379_p7 = pnand %p377_p6, %p374_p5 }
 0x1e8   :  { %382 = shalt.err (!%p379_p7)
}
 0x1e9   :  { %s387_s15 = smov 128   ;;  %s388_s16 = smov 8  }
 0x1ea   :  { %247 = dma.vmem_to_hbm [thread:$0]  %s242_s7, 256, %s510_s3, [#allocation4], %s387_s15, %s387_s15, %s388_s16  }
 0x1eb   :  { %383 = dma.done.wait [#allocation4], 256  }
 0x1ec   :  { %384 = vsyncadd [#allocation4], 4294967040 }
 0x1ed   :  { %251 = vsyncpa [#allocation4], 1 }

</bundles_post_ra>
